<compile_context>
chip_gen: v5e
topology: v5e:2x2
jax: 0.10.0
libtpu: 0.0.40
codegen_flags: <defaults>
</compile_context>

<pallas_src>
import functools

import jax
import jax.numpy as jnp
from jax.experimental import pallas as pl
from jax.experimental.pallas import tpu as pltpu


_EPS = 1e-12  # matches torch.nn.functional.normalize default eps


def _round_up(x: int, m: int) -> int:
    return ((x + m - 1) // m) * m


def _l2_normalize(x):
    nrm = jnp.sqrt(jnp.sum(x * x, axis=-1, keepdims=True))
    return x / jnp.maximum(nrm, _EPS)


def _default_compute_dtype():
    """bf16 hot path on chips with bf16 VPU/MXU (v6e/v7x); f32 otherwise (v5e etc.)."""
    try:
        kind = jax.devices()[0].device_kind.lower()
    except Exception:
        return jnp.float32
    if ("v6" in kind) or ("v7" in kind) or ("7x" in kind):
        return jnp.bfloat16
    return jnp.float32


def _transe_kernel(b_ref, pn_ref, negT_ref, pos_o_ref, neg_o_ref,
                   *, p_norm: int, d_chunk: int):
    j = pl.program_id(1)

    b = b_ref[...]          # (tq, d)  float32: s*rel - normalize(query)
    negT = negT_ref[...]    # (d, tn)  compute dtype: normalized negatives, transposed

    # ---- positive distances: once per query tile (resident output block) ----
    @pl.when(j == 0)
    def _():
        pos_delta = b + pn_ref[...]                                     # (tq, d) f32
        if p_norm == 1:
            pos_dist = jnp.sum(jnp.abs(pos_delta), axis=-1, keepdims=True)
        else:
            pos_dist = jnp.sqrt(jnp.sum(pos_delta * pos_delta, axis=-1,
                                        keepdims=True))
        pos_o_ref[...] = (-pos_dist).astype(pos_o_ref.dtype)            # (tq, 1)

    # ---- negative distances --------------------------------------------------
    b_c = b.astype(negT.dtype)   # tiny (tq*d) cast; negT already streamed in compute dtype
    if p_norm == 2:
        # ||b_i + n_j||^2 = ||b_i||^2 + 1 + 2 b_i.n_j   (negatives are unit vectors)
        cross = jnp.dot(b_c, negT, preferred_element_type=jnp.float32)  # (tq, tn) MXU
        b_sq = jnp.sum(b * b, axis=-1, keepdims=True)                   # (tq, 1)  f32
        neg_dist = jnp.sqrt(jnp.maximum(b_sq + 1.0 + 2.0 * cross, 0.0))
    else:
        # p = 1: |b_i + n_j| summed over d, chunked along d (sublane axis) so the
        # live (tq, dc, tn) broadcast temp stays small; reduce via XLU sublane sum
        # with an f32 accumulator (VALU only carries the broadcast-add + abs).
        d = b.shape[1]
        acc = jnp.zeros(neg_o_ref.shape, jnp.float32)                   # (tq, tn)
        for k0 in range(0, d, d_chunk):
            k1 = min(k0 + d_chunk, d)
            delta = b_c[:, k0:k1, None] + negT[None, k0:k1, :]          # (tq, dc, tn)
            acc = acc + jnp.sum(jnp.abs(delta), axis=1, dtype=jnp.float32)
        neg_dist = acc
    neg_o_ref[...] = (-neg_dist).astype(neg_o_ref.dtype)


def transe_decoder_forward(query_embeds, pos_target_embeds, neg_target_embeds,
                           r_type, is_head_prediction, relation_weight,
                           *, distance_norm: int = 1, add_batch_to_negs: bool = False,
                           block_q: int = 256, block_n=None, d_chunk: int = 8,
                           compute_dtype=None):
    """Pallas implementation of TransEDecoder.forward.

    Returns (-pos_distances [Q], -neg_distances [Q, N(+Q if add_batch_to_negs)]).
    """
    if distance_norm not in (1, 2):
        # TODO(synk): torch.norm supports arbitrary p; only p in {1, 2} implemented.
        raise NotImplementedError("distance_norm must be 1 or 2")

    Q, d = query_embeds.shape
    if compute_dtype is None:
        compute_dtype = _default_compute_dtype()
    if block_n is None:
        block_n = 1024 if distance_norm == 2 else 512

    # ---- tiny O((Q+N)*d) glue (XLA-fused): gather, sign-fold, normalize ------
    rel = jnp.take(relation_weight.astype(jnp.float32),
                   r_type.astype(jnp.int32), axis=0)                     # (Q, d)
    sign = jnp.where(is_head_prediction.reshape(-1, 1), 1.0, -1.0).astype(jnp.float32)
    b = sign * rel - _l2_normalize(query_embeds.astype(jnp.float32))     # (Q, d)
    pn = _l2_normalize(pos_target_embeds.astype(jnp.float32))            # (Q, d)

    neg_all = neg_target_embeds.astype(jnp.float32)
    if add_batch_to_negs:
        neg_all = jnp.concatenate(
            [neg_all, pos_target_embeds.astype(jnp.float32)], axis=0)
    N = neg_all.shape[0]
    neg_n = _l2_normalize(neg_all)                                       # (N, d) unit rows

    # ---- tiling ---------------------------------------------------------------
    q8 = _round_up(Q, 8)
    tq = min(_round_up(block_q, 8), q8)
    if tq >= q8 and q8 >= 16:
        # single Q tile: split it so megacore / v7x's 2nd TensorCore has work.
        tq = _round_up(q8 // 2, 8)
    Qp = _round_up(Q, tq)

    tn = min(_round_up(block_n, 128), _round_up(N, 128))
    Np = _round_up(N, tn)

    def pad_rows(x, rows):
        return x if x.shape[0] == rows else jnp.pad(x, ((0, rows - x.shape[0]), (0, 0)))

    b_p = pad_rows(b, Qp)                                                # (Qp, d) f32
    pn_p = pad_rows(pn, Qp)                                              # (Qp, d) f32
    negT = pad_rows(neg_n, Np).T.astype(compute_dtype)                   # (d, Np)

    kernel = functools.partial(_transe_kernel, p_norm=distance_norm, d_chunk=d_chunk)

    pos_o, neg_o = pl.pallas_call(
        kernel,
        out_shape=(
            jax.ShapeDtypeStruct((Qp, 1), jnp.float32),
            jax.ShapeDtypeStruct((Qp, Np), jnp.float32),
        ),
        grid_spec=pltpu.PrefetchScalarGridSpec(
            num_scalar_prefetch=0,
            grid=(Qp // tq, Np // tn),
            in_specs=[
                pl.BlockSpec((tq, d), lambda i, j: (i, 0)),   # b tile (resident over j)
                pl.BlockSpec((tq, d), lambda i, j: (i, 0)),   # normalized pos targets
                pl.BlockSpec((d, tn), lambda i, j: (0, j)),   # normalized negT tile
            ],
            out_specs=(
                pl.BlockSpec((tq, 1), lambda i, j: (i, 0)),   # -pos dist (written at j==0)
                pl.BlockSpec((tq, tn), lambda i, j: (i, j)),  # -neg dist (lane-dense)
            ),
        ),
        compiler_params=pltpu.CompilerParams(
            dimension_semantics=("parallel", "arbitrary"),
        ),
    )(b_p, pn_p, negT)

    return pos_o[:Q, 0], neg_o[:Q, :N]


# ----------------------------- pure-JAX reference -----------------------------
def _reference(query, pos, neg, r_type, is_head, rel_weight, *, p=1,
               add_batch_to_negs=False):
    rel = rel_weight[r_type]

    def normalize(x):
        nrm = jnp.linalg.norm(x, axis=-1, keepdims=True)
        return x / jnp.maximum(nrm, _EPS)

    ih2 = is_head.reshape(-1, 1)
    head = jnp.where(ih2, pos, query)
    tail = jnp.where(ih2, query, pos)

    negs = jnp.concatenate([neg, pos], axis=0) if add_batch_to_negs else neg
    Q, d = query.shape
    Nn = negs.shape[0]
    neg_t = jnp.broadcast_to(negs[None, :, :], (Q, Nn, d))
    q_exp = jnp.broadcast_to(query[:, None, :], (Q, Nn, d))
    ih3 = is_head.reshape(-1, 1, 1)
    neg_head = jnp.where(ih3, neg_t, q_exp)
    neg_tail = jnp.where(ih3, q_exp, neg_t)

    def dist(h, r, t):
        delta = normalize(h) + r - normalize(t)
        if p == 1:
            return jnp.sum(jnp.abs(delta), axis=-1)
        return jnp.sqrt(jnp.sum(delta * delta, axis=-1))

    return -dist(head, rel, tail), -dist(neg_head, rel[:, None, :], neg_tail)


if __name__ == "__main__":
    embed_dim = 32
    num_relations = 8
    Q = 48
    num_negs = 100   # intentionally not a multiple of 128 (exercises N padding)

    key = jax.random.PRNGKey(0)
    k_q, k_p, k_n, k_r, k_h, k_w = jax.random.split(key, 6)

    query = jax.random.normal(k_q, (Q, embed_dim), dtype=jnp.float32)
    pos = jax.random.normal(k_p, (Q, embed_dim), dtype=jnp.float32)
    negs = jax.random.normal(k_n, (num_negs, embed_dim), dtype=jnp.float32)
    r_type = jax.random.randint(k_r, (Q,), 0, num_relations, dtype=jnp.int32)
    is_head = jax.random.bernoulli(k_h, 0.5, (Q,))
    bound = (6.0 / (num_relations + embed_dim)) ** 0.5   # xavier-uniform-style init
    rel_w = jax.random.uniform(k_w, (num_relations, embed_dim),
                               minval=-bound, maxval=bound, dtype=jnp.float32)

    # Tolerances depend on whether the hot loop auto-selects bf16 (v6e/v7x).
    bf16 = _default_compute_dtype() == jnp.bfloat16
    tol1 = dict(atol=1.5e-1, rtol=2e-2) if bf16 else dict(atol=1e-4, rtol=1e-4)
    tol2 = dict(atol=5e-2, rtol=2e-2) if bf16 else dict(atol=2e-3, rtol=2e-3)

    # Case 1: L1 distance (module default), no in-batch negatives.
    # Small tiles force a (3 q-tiles x 1 n-tile) grid.
    pos_s, neg_s = transe_decoder_forward(query, pos, negs, r_type, is_head, rel_w,
                                          distance_norm=1, add_batch_to_negs=False,
                                          block_q=16, block_n=128)
    pos_s = jax.block_until_ready(pos_s)
    ref_pos, ref_neg = _reference(query, pos, negs, r_type, is_head, rel_w,
                                  p=1, add_batch_to_negs=False)
    assert pos_s.shape == (Q,) and neg_s.shape == (Q, num_negs)
    assert jnp.allclose(pos_s, ref_pos, **tol1), "pos mismatch (p=1)"
    assert jnp.allclose(neg_s, ref_neg, **tol1), "neg mismatch (p=1)"

    # Case 2: L2 distance with in-batch negatives; (3 x 2) grid exercises the
    # resident pos output block (write only at j == 0) and the MXU path.
    pos2, neg2 = transe_decoder_forward(query, pos, negs, r_type, is_head, rel_w,
                                        distance_norm=2, add_batch_to_negs=True,
                                        block_q=16, block_n=128)
    pos2 = jax.block_until_ready(pos2)
    ref_pos2, ref_neg2 = _reference(query, pos, negs, r_type, is_head, rel_w,
                                    p=2, add_batch_to_negs=True)
    assert neg2.shape == (Q, num_negs + Q)
    assert jnp.allclose(pos2, ref_pos2, **tol2), "pos mismatch (p=2)"
    assert jnp.allclose(neg2, ref_neg2, **tol2), "neg mismatch (p=2)"

    # Case 3: default (auto-sized) tiles, L1 — exercises the small-Q tile split.
    pos3, neg3 = transe_decoder_forward(query, pos, negs, r_type, is_head, rel_w,
                                        distance_norm=1, add_batch_to_negs=False)
    pos3 = jax.block_until_ready(pos3)
    assert jnp.allclose(pos3, ref_pos, **tol1), "pos mismatch (default tiles)"
    assert jnp.allclose(neg3, ref_neg, **tol1), "neg mismatch (default tiles)"

    print("KERNEL_OK")
</pallas_src>

<mosaic_0001>
module attributes {stable_mosaic.version = 11 : i64} {
  func.func @_transe_kernel(%arg0: i32, %arg1: i32, %arg2: memref<16x32xf32, #tpu.memory_space<vmem>>, %arg3: memref<16x32xf32, #tpu.memory_space<vmem>>, %arg4: memref<32x128xf32, #tpu.memory_space<vmem>>, %arg5: memref<16x1xf32, #tpu.memory_space<vmem>>, %arg6: memref<16x128xf32, #tpu.memory_space<vmem>>) attributes {dimension_semantics = [#tpu.dimension_semantics<parallel>, #tpu.dimension_semantics<arbitrary>], iteration_bounds = array<i64: 3, 1>, scalar_prefetch = 0 : i64, scratch_operands = 0 : i64, tpu.core_type = #tpu.core_type<tc>, window_params = [{transform_indices = @transform_0, window_bounds = array<i64: 16, 32>}, {transform_indices = @transform_1, window_bounds = array<i64: 16, 32>}, {transform_indices = @transform_2, window_bounds = array<i64: 32, 128>}, {transform_indices = @transform_3, window_bounds = array<i64: 16, 1>}, {transform_indices = @transform_4, window_bounds = array<i64: 16, 128>}]} {
    %c0 = arith.constant 0 : index
    %c0_0 = arith.constant 0 : index
    %0 = vector.load %arg2[%c0, %c0_0] : memref<16x32xf32, #tpu.memory_space<vmem>>, vector<16x32xf32>
    %c0_1 = arith.constant 0 : index
    %c0_2 = arith.constant 0 : index
    %1 = vector.load %arg4[%c0_1, %c0_2] : memref<32x128xf32, #tpu.memory_space<vmem>>, vector<32x128xf32>
    %c0_i32 = arith.constant 0 : i32
    %2 = arith.cmpi eq, %arg1, %c0_i32 : i32
    %3 = arith.extui %2 : i1 to i32
    %c0_i32_3 = arith.constant 0 : i32
    %4 = arith.cmpi ne, %3, %c0_i32_3 : i32
    scf.if %4 {
      %c0_11 = arith.constant 0 : index
      %c0_12 = arith.constant 0 : index
      %49 = vector.load %arg3[%c0_11, %c0_12] : memref<16x32xf32, #tpu.memory_space<vmem>>, vector<16x32xf32>
      %50 = arith.addf %0, %49 : vector<16x32xf32>
      %51 = math.absf %50 : vector<16x32xf32>
      %cst_13 = arith.constant dense<0.000000e+00> : vector<16xf32>
      %52 = vector.multi_reduction <add>, %51, %cst_13 [1] : vector<16x32xf32> to vector<16xf32>
      %53 = vector.shape_cast %52 : vector<16xf32> to vector<16x1xf32>
      %cst_14 = arith.constant 0.000000e+00 : f32
      %54 = vector.broadcast %cst_14 : f32 to vector<16x1xf32>
      %55 = arith.subf %54, %53 : vector<16x1xf32>
      %c0_15 = arith.constant 0 : index
      %c0_16 = arith.constant 0 : index
      %56 = vector.load %arg5[%c0_15, %c0_16] : memref<16x1xf32, #tpu.memory_space<vmem>>, vector<16x1xf32>
      tpu.vector_store %arg5[%c0_15, %c0_16], %55 {strides = array<i32>} : memref<16x1xf32, #tpu.memory_space<vmem>>, vector<16x1xf32>,
    } else {
    }
    %cst = arith.constant 0.000000e+00 : f32
    %5 = vector.broadcast %cst : f32 to vector<16x128xf32>
    %6 = vector.extract_strided_slice %0 {offsets = [0, 0], sizes = [16, 8], strides = [1, 1]} : vector<16x32xf32> to vector<16x8xf32>
    %7 = vector.shape_cast %6 : vector<16x8xf32> to vector<16x8x1xf32>
    %8 = vector.extract_strided_slice %1 {offsets = [0, 0], sizes = [8, 128], strides = [1, 1]} : vector<32x128xf32> to vector<8x128xf32>
    %9 = vector.shape_cast %8 : vector<8x128xf32> to vector<1x8x128xf32>
    %10 = vector.broadcast %7 : vector<16x8x1xf32> to vector<16x8x128xf32>
    %11 = vector.broadcast %9 : vector<1x8x128xf32> to vector<16x8x128xf32>
    %12 = arith.addf %10, %11 : vector<16x8x128xf32>
    %13 = math.absf %12 : vector<16x8x128xf32>
    %cst_4 = arith.constant dense<0.000000e+00> : vector<16x128xf32>
    %14 = vector.multi_reduction <add>, %13, %cst_4 [1] : vector<16x8x128xf32> to vector<16x128xf32>
    %15 = arith.addf %5, %14 : vector<16x128xf32>
    %16 = vector.extract_strided_slice %0 {offsets = [0, 8], sizes = [16, 8], strides = [1, 1]} : vector<16x32xf32> to vector<16x8xf32>
    %17 = vector.shape_cast %16 : vector<16x8xf32> to vector<16x8x1xf32>
    %18 = vector.extract_strided_slice %1 {offsets = [8, 0], sizes = [8, 128], strides = [1, 1]} : vector<32x128xf32> to vector<8x128xf32>
    %19 = vector.shape_cast %18 : vector<8x128xf32> to vector<1x8x128xf32>
    %20 = vector.broadcast %17 : vector<16x8x1xf32> to vector<16x8x128xf32>
    %21 = vector.broadcast %19 : vector<1x8x128xf32> to vector<16x8x128xf32>
    %22 = arith.addf %20, %21 : vector<16x8x128xf32>
    %23 = math.absf %22 : vector<16x8x128xf32>
    %cst_5 = arith.constant dense<0.000000e+00> : vector<16x128xf32>
    %24 = vector.multi_reduction <add>, %23, %cst_5 [1] : vector<16x8x128xf32> to vector<16x128xf32>
    %25 = arith.addf %15, %24 : vector<16x128xf32>
    %26 = vector.extract_strided_slice %0 {offsets = [0, 16], sizes = [16, 8], strides = [1, 1]} : vector<16x32xf32> to vector<16x8xf32>
    %27 = vector.shape_cast %26 : vector<16x8xf32> to vector<16x8x1xf32>
    %28 = vector.extract_strided_slice %1 {offsets = [16, 0], sizes = [8, 128], strides = [1, 1]} : vector<32x128xf32> to vector<8x128xf32>
    %29 = vector.shape_cast %28 : vector<8x128xf32> to vector<1x8x128xf32>
    %30 = vector.broadcast %27 : vector<16x8x1xf32> to vector<16x8x128xf32>
    %31 = vector.broadcast %29 : vector<1x8x128xf32> to vector<16x8x128xf32>
    %32 = arith.addf %30, %31 : vector<16x8x128xf32>
    %33 = math.absf %32 : vector<16x8x128xf32>
    %cst_6 = arith.constant dense<0.000000e+00> : vector<16x128xf32>
    %34 = vector.multi_reduction <add>, %33, %cst_6 [1] : vector<16x8x128xf32> to vector<16x128xf32>
    %35 = arith.addf %25, %34 : vector<16x128xf32>
    %36 = vector.extract_strided_slice %0 {offsets = [0, 24], sizes = [16, 8], strides = [1, 1]} : vector<16x32xf32> to vector<16x8xf32>
    %37 = vector.shape_cast %36 : vector<16x8xf32> to vector<16x8x1xf32>
    %38 = vector.extract_strided_slice %1 {offsets = [24, 0], sizes = [8, 128], strides = [1, 1]} : vector<32x128xf32> to vector<8x128xf32>
    %39 = vector.shape_cast %38 : vector<8x128xf32> to vector<1x8x128xf32>
    %40 = vector.broadcast %37 : vector<16x8x1xf32> to vector<16x8x128xf32>
    %41 = vector.broadcast %39 : vector<1x8x128xf32> to vector<16x8x128xf32>
    %42 = arith.addf %40, %41 : vector<16x8x128xf32>
    %43 = math.absf %42 : vector<16x8x128xf32>
    %cst_7 = arith.constant dense<0.000000e+00> : vector<16x128xf32>
    %44 = vector.multi_reduction <add>, %43, %cst_7 [1] : vector<16x8x128xf32> to vector<16x128xf32>
    %45 = arith.addf %35, %44 : vector<16x128xf32>
    %cst_8 = arith.constant 0.000000e+00 : f32
    %46 = vector.broadcast %cst_8 : f32 to vector<16x128xf32>
    %47 = arith.subf %46, %45 : vector<16x128xf32>
    %c0_9 = arith.constant 0 : index
    %c0_10 = arith.constant 0 : index
    %48 = vector.load %arg6[%c0_9, %c0_10] : memref<16x128xf32, #tpu.memory_space<vmem>>, vector<16x128xf32>
    tpu.vector_store %arg6[%c0_9, %c0_10], %47 {strides = array<i32>} : memref<16x128xf32, #tpu.memory_space<vmem>>, vector<16x128xf32>,
    return
  }
  func.func @transform_0(%arg0: i32, %arg1: i32) -> (i32, i32) {
    %c0_i32 = arith.constant 0 : i32
    %c0_i32_0 = arith.constant 0 : i32
    return %arg0, %c0_i32 : i32, i32
  }
  func.func @transform_1(%arg0: i32, %arg1: i32) -> (i32, i32) {
    %c0_i32 = arith.constant 0 : i32
    %c0_i32_0 = arith.constant 0 : i32
    return %arg0, %c0_i32 : i32, i32
  }
  func.func @transform_2(%arg0: i32, %arg1: i32) -> (i32, i32) {
    %c0_i32 = arith.constant 0 : i32
    %c0_i32_0 = arith.constant 0 : i32
    return %c0_i32, %arg1 : i32, i32
  }
  func.func @transform_3(%arg0: i32, %arg1: i32) -> (i32, i32) {
    %c0_i32 = arith.constant 0 : i32
    %c0_i32_0 = arith.constant 0 : i32
    return %arg0, %c0_i32 : i32, i32
  }
  func.func @transform_4(%arg0: i32, %arg1: i32) -> (i32, i32) {
    %c0_i32 = arith.constant 0 : i32
    return %arg0, %arg1 : i32, i32
  }
}

</mosaic_0001>

<bundles_post_ra>
// kernel: tpu_custom_call.1
= control target key start
LH: loop header
LB: loop body
LE: loop exit
PB: predicated region body
PF: predicated region fallthrough
CT: control target
= control target key end

     0   :  { %10 = vsyncpa [#allocation3], 0  ;;  %s2146_s0 = inlined_call_operand.vmem [shape: f32[48,32], index: 0, kind: input, shape index: {}]   ;;  %s2147_s1 = inlined_call_operand.vmem [shape: f32[48,32], index: 1, kind: input, shape index: {}]   ;;  %s2148_s2 = inlined_call_operand.vmem [shape: f32[32,128], index: 2, kind: input, shape index: {}]   ;;  %s2149_s3 = inlined_call_operand.vmem [shape: f32[48,1], index: 3, kind: output, shape index: {0}]   ;;  %s2150_s4 = inlined_call_operand.hbm [shape: f32[48,128], index: 4, kind: output, shape index: {1}]  }
   0x1   :  { %12 = vsyncpa [#allocation3 + $0x1], 0  ;;  %s1672_s15 = smov 0   ;;  %s1674_s16 = smov 0  }
   0x2   :  { %s1676_s17 = smov 0   ;;  %s1678_s18 = smov 0  }
   0x3   :  { %s1680_s19 = smov 0   ;;  %s1682_s20 = smov 0  }
   0x4 LB: > { %s1477_s21 = sadd.s32 4294967295, %s1643_s20   ;;  %s1478_s22 = sadd.s32 4294967294, %s1643_s20   ;;  %s1643_s20 = sphi %s1682_s20, %s18_s20   ;;  %s1639_s19 = sphi %s1680_s19, %s2157_s19   ;;  %s1635_s18 = sphi %s1678_s18, %s2156_s18   ;;  %s1631_s17 = sphi %s1676_s17, %s2155_s17   ;;  %s1627_s16 = sphi %s1674_s16, %s2154_s16   ;;  %s1623_s15 = sphi %s1672_s15, %s2153_s15  }
   0x5   : > { %s30_s23 = sadd.s32 1, %s1639_s19  ;;  %s143_s24 = sadd.s32 1, %s1631_s17 }
   0x6   : > { %p32_p0 = scmp.ge.s32.totalorder %s30_s23, 3  ;;  %p153_p1 = scmp.ne.s32.totalorder %s1631_s17, %s1627_s16 }
   0x7   : > { %p154_p2 = scmp.eq.s32.totalorder %s1477_s21, 2  ;;  %p159_p3 = scmp.ne.s32.totalorder %s1627_s16, %s1623_s15 }
   0x8   : > { %s2159_s23 = smov (%p32_p0, %s30_s23), 0  ;;  %p160_p5 = scmp.eq.s32.totalorder %s1478_s22, 2 }
   0x9   : > { %p1712_p4 = por %p154_p2, %p153_p1  ;;  %s138_s26 = ssub.s32 %s1639_s19, %s2159_s23 }
   0xa   : > { %p1482_p6 = scmp.ge.s32.totalorder %s1643_s20, 1  ;;  %p141_p7 = scmp.eq.s32.totalorder %s138_s26, 0 }
   0xb   : > { %p1719_p8 = por %p160_p5, %p159_p3  ;;  %p203_p9 = scmp.lt.s32.totalorder %s1643_s20, 4 }
   0xc   : > { %s1725_s28 = scalar_select %p141_p7, %s1631_s17, %s143_s24  }
   0xd   : > { %p204_p10 = pnand %p1482_p6, %p203_p9 }
   0xe   : > { %s1484_s29 = sshll.u32 (!%p204_p10), %s1635_s18, 1  ;;  %s240_s6 = sand.u32 (!%p204_p10), 1, %s1627_s16  }
   0xf   : > { %207 = sbr.rel (%p204_p10) target bundleno = 381 (0x17d), region = 32  ;;  %p244_p11 = scmp.lt.s32.totalorder (!%p204_p10), %s1484_s29, 5 }
  0x10   : > { %s1495_s8 = sshll.u32 (!%p204_p10), %s1635_s18, 4  ;;  %s1333_s14 = scalar_lea.sflag (!%p204_p10), [#allocation3], %s240_s6 }
  0x11   : > { %s1349_s11 = scalar_lea.hbm (!%p204_p10), %s2150_s4, %s1495_s8 }
  0x14   : > { %v295_v0 = vlaneseq  ;;  %s2161_s29 = smov (!%p244_p11, %s1484_s29), 5  ;;  %vm282_vm0 = vcmask 261120   ;;  %vm291_vm1 = vcmask 7168   ;;  %v1832_v43 = vld [vmem:[%s2148_s2] sm:$0xff]  ;;  %vm1302_vm2 = vcmask 1041409  }
  0x15   : > { %s1732_s30 = sshll.u32 %s2161_s29, 3  ;;  %vm1304_vm3 = vcmask 1042434   ;;  %vm1306_vm4 = vcmask 1043459   ;;  %vm1308_vm5 = vcmask 1044484   ;;  %vm1310_vm6 = vcmask 1045509   ;;  %s1585_s29 = scalar_lea.hbm %s2150_s4, 48 }
  0x16   : > { %v1728_v1 = vshrl.u32 %v295_v0, 7  ;;  %s247_s7 = scalar_lea.vmem %s2146_s0, %s1732_s30  ;;  %s253_s10 = scalar_lea.vmem %s2147_s1, %s1732_s30  ;;  %vm1312_vm7 = vcmask 1046534   ;;  %vm1314_vm8 = vcmask 1047559  }
  0x17   : > { %v266_v2 = vld [vmem:[%s247_s7] sm:$0xff]  ;;  %v267_v4 = vld [vmem:[%s247_s7 + $0x8] sm:$0xff]  ;;  %s263_s13 = scalar_lea.vmem %s2149_s3, %s1732_s30  ;;  %s1483_s7 = sshll.u32 %s240_s6, 4 }
  0x18   : > { %1554 = vset.pattern.permute.xlu2 %v1728_v1  ;;  %1553 = vset.pattern.permute.xlu1 %v1728_v1  ;;  %v276_v3 = vld [vmem:[%s253_s10] sm:$0xff]  ;;  %v1743_v5 = vperm.slane %v266_v2, 2  ;;  %v1745_v6 = vperm.slane %v266_v2, 0  ;;  %v277_v8 = vld [vmem:[%s253_s10 + $0x8] sm:$0xff]  ;;  %v1749_v13 = vperm.slane %v266_v2, 3  ;;  %v1751_v14 = vperm.slane %v266_v2, 1 }
  0x19   : > { %1555 = vset.pattern.permute.xlu0 %v1728_v1  ;;  %v278_v7 = vadd.f32 %v276_v3, %v266_v2  ;;  %v279_v10 = vadd.f32 %v277_v8, %v267_v4  ;;  %v1755_v16 = vperm.slane %v266_v2, 6  ;;  %v1757_v17 = vperm.slane %v266_v2, 5  ;;  %s242_s18 = scalar_lea.vmem [#allocation2], %s1483_s7 }
  0x1a   : > { %v1761_v18 = vperm.slane %v267_v4, 0  ;;  %v1763_v19 = vperm.slane %v266_v2, 7  ;;  %v1767_v20 = vperm.slane %v266_v2, 4  ;;  %v1769_v21 = vperm.slane %v267_v4, 2  ;;  %s1350_s12 = sshll.u32 %s242_s18, 4  ;;  %s1351_s12 = int_to_ptr.vmem [resolvable:$true] %s1350_s12 }
  0x1b   : > { %v280_v9 = vand.u32 2147483647, %v278_v7  ;;  %v281_v12 = vand.u32 2147483647, %v279_v10  ;;  %v1771_v22 = vperm.slane %v267_v4, 1  ;;  %v1776_v23 = vperm.slane %v267_v4, 7 }
  0x1c   : > { %v1778_v24 = vperm.slane %v267_v4, 4  ;;  %v1780_v25 = vperm.slane %v267_v4, 3  ;;  %v552_v26 = vadd.s32 8, %v1728_v1  ;;  %v1786_v27 = vperm.slane %v267_v4, 6  ;;  %v1855_v7 = vld [vmem:[%s2148_s2 + $0x8] sm:$0xff] }
  0x1d   : > { %v283_v11 = vsel %vm282_vm0, %v280_v9, 0.0  ;;  %v286_v15 = vsel %vm282_vm0, %v281_v12, 0.0  ;;  %v1788_v28 = vperm.slane %v267_v4, 5  ;;  %v792_v29 = vadd.s32 16, %v1728_v1 }
  0x1e   : > { %284 = vadd.xlane.f32.xlu0 %v283_v11  ;;  %v1825_v41 = vadd.s32 24, %v1728_v1 }
  0x20   : > { %313 = vperm.xlu2 %1554, %v1743_v5   ;;  %299 = vperm.xlu1 %1553, %v1745_v6  }
  0x26   : > { %287 = vadd.xlane.f32.xlu0 %v286_v15 }
  0x28   : > { %320 = vperm.xlu2 %1554, %v1749_v13   ;;  %306 = vperm.xlu1 %1553, %v1751_v14  }
  0x30   : > { %341 = vperm.xlu2 %1554, %v1755_v16   ;;  %334 = vperm.xlu1 %1553, %v1757_v17  }
  0x38   : > { %355 = vperm.xlu2 %1554, %v1761_v18   ;;  %348 = vperm.xlu1 %1553, %v1763_v19  }
  0x3a   : > { %327 = vperm.xlu0 %1555, %v1767_v20  }
  0x40   : > { %369 = vperm.xlu2 %1554, %v1769_v21   ;;  %362 = vperm.xlu1 %1553, %v1771_v22  }
  0x42   : > { %404 = vperm.xlu0 %1555, %v1776_v23  }
  0x48   : > { %383 = vperm.xlu2 %1554, %v1778_v24   ;;  %376 = vperm.xlu1 %1553, %v1780_v25  }
  0x4a   : > { %1558 = vset.pattern.permute.xlu0 %v552_v26 }
  0x50   : > { %397 = vperm.xlu2 %1554, %v1786_v27   ;;  %390 = vperm.xlu1 %1553, %v1788_v28  }
  0x52   : > { %566 = vperm.xlu0 %1558, %v1743_v5  }
  0x58   : > { %1557 = vset.pattern.permute.xlu2 %v552_v26  ;;  %1556 = vset.pattern.permute.xlu1 %v552_v26 }
  0x5a   : > { %596 = vperm.xlu0 %1558, %v1763_v19  }
  0x60   : > { %560 = vperm.xlu2 %1557, %v1751_v14   ;;  %554 = vperm.xlu1 %1556, %v1745_v6  }
  0x62   : > { %614 = vperm.xlu0 %1558, %v1769_v21  }
  0x68   : > { %578 = vperm.xlu2 %1557, %v1767_v20   ;;  %572 = vperm.xlu1 %1556, %v1749_v13  }
  0x6a   : > { %632 = vperm.xlu0 %1558, %v1788_v28  }
  0x70   : > { %590 = vperm.xlu2 %1557, %v1755_v16   ;;  %584 = vperm.xlu1 %1556, %v1757_v17  }
  0x72   : > { %1559 = vset.pattern.permute.xlu0 %v792_v29 }
  0x78   : > { %608 = vperm.xlu2 %1557, %v1771_v22   ;;  %602 = vperm.xlu1 %1556, %v1761_v18  }
  0x7a   : > { %v314_v30 = vpop.permute.xlu2 %313  ;;  %794 = vperm.xlu0 %1559, %v1745_v6  }
  0x7b   : > { %v408_v44 = vadd.f32 %v314_v30, %v1832_v43 }
  0x7d   : > { %v424_v46 = vand.u32 2147483647, %v408_v44 }
  0x7f   : > { %v450_v51 = vrot.slane %v424_v46, 4 }
  0x80   : > { %626 = vperm.xlu2 %1557, %v1778_v24   ;;  %620 = vperm.xlu1 %1556, %v1780_v25  }
  0x81   : > { %v451_v60 = vadd.f32 %v450_v51, %v424_v46 }
  0x82   : > { %v321_v31 = vpop.permute.xlu2 %320  ;;  %824 = vperm.xlu0 %1559, %v1757_v17  }
  0x83   : > { %v409_v49 = vadd.f32 %v321_v31, %v1832_v43  ;;  %v452_v4 = vrot.slane %v451_v60, 2 }
  0x85   : > { %v425_v53 = vand.u32 2147483647, %v409_v49  ;;  %v453_v26 = vadd.f32 %v452_v4, %v451_v60 }
  0x87   : > { %v456_v62 = vrot.slane %v425_v53, 4 }
  0x88   : > { %644 = vperm.xlu2 %1557, %v1776_v23   ;;  %638 = vperm.xlu1 %1556, %v1786_v27  }
  0x89   : > { %v457_v9 = vadd.f32 %v456_v62, %v425_v53 }
  0x8a   : > { %v342_v32 = vpop.permute.xlu2 %341  ;;  %842 = vperm.xlu0 %1559, %v1761_v18  }
  0x8b   : > { %v412_v50 = vadd.f32 %v342_v32, %v1832_v43 }
  0x8d   : > { %v428_v58 = vand.u32 2147483647, %v412_v50 }
  0x8f   : > { %v474_v2 = vrot.slane %v428_v58, 4 }
  0x90   : > { %1561 = vset.pattern.permute.xlu2 %v792_v29  ;;  %1560 = vset.pattern.permute.xlu1 %v792_v29 }
  0x91   : > { %v285_v35 = vpop.xlane.xlu0 %284 }
  0x92   : > { %v300_v33 = vpop.permute.xlu1 %299  ;;  %v1812_v34 = vpop.permute.xlu2 %355  ;;  %860 = vperm.xlu0 %1559, %v1780_v25   ;;  %v289_v36 = vsub.f32 0.0, %v285_v35 }
  0x93   : > { %v406_v54 = vadd.f32 %v300_v33, %v1832_v43  ;;  %v458_v33 = vrot.slane %v457_v9, 2  ;;  %v1864_v44 = vadd.f32 %v1812_v34, %v1832_v43 }
  0x94   : > { %292 = vst.msk [vmem:[%s263_s13] sm:$0xff] %vm291_vm1, %v289_v36 }
  0x95   : > { %v422_v63 = vand.u32 2147483647, %v406_v54  ;;  %v459_v50 = vadd.f32 %v458_v33, %v457_v9 }
  0x97   : > { %v438_v10 = vrot.slane %v422_v63, 4 }
  0x98   : > { %806 = vperm.xlu2 %1561, %v1743_v5   ;;  %800 = vperm.xlu1 %1560, %v1751_v14  }
  0x99   : > { %v288_v38 = vpop.xlane.xlu0 %287  ;;  %v439_v35 = vadd.f32 %v438_v10, %v422_v63 }
  0x9a   : > { %v307_v37 = vpop.permute.xlu1 %306  ;;  %878 = vperm.xlu0 %1559, %v1786_v27   ;;  %v370_v39 = vpop.permute.xlu2 %369  ;;  %v290_v40 = vsub.f32 0.0, %v288_v38 }
  0x9b   : > { %v407_v48 = vadd.f32 %v307_v37, %v1832_v43  ;;  %v416_v55 = vadd.f32 %v370_v39, %v1832_v43  ;;  %v440_v51 = vrot.slane %v439_v35, 2 }
  0x9c   : > { %293 = vst.msk [vmem:[%s263_s13 + $0x8] sm:$0xff] %vm291_vm1, %v290_v40  ;;  %v454_v40 = vrot.slane %v453_v26, 1  ;;  %s1352_s13 = sshll.u32 %s1349_s11, 4  ;;  %s1353_s13 = int_to_ptr.hbm [resolvable:$true] %s1352_s13 }
  0x9d   : > { %v423_v52 = vand.u32 2147483647, %v407_v48  ;;  %v432_v0 = vand.u32 2147483647, %v416_v55  ;;  %s1579_s21 = sshra.s32 %s1353_s13, 4  ;;  %s1580_s21 = int_to_ptr.hbm [resolvable:$true] %s1579_s21 }
  0x9e   : > { %s1581_s22 = scalar_lea.hbm %s1580_s21, 16  ;;  %p1586_p1 = scmp.lt.s32.totalorder %s1580_s21, %s2150_s4 }
  0x9f   : > { %v444_v61 = vrot.slane %v423_v52, 4  ;;  %v498_v11 = vrot.slane %v432_v0, 4  ;;  %p1582_p12 = scmp.ne.s32.totalorder %s1580_s21, %s1581_s22  ;;  %p1587_p2 = scmp.lt.s32.totalorder %s1585_s29, %s1581_s22 }
  0xa0   : > { %818 = vperm.xlu2 %1561, %v1767_v20   ;;  %812 = vperm.xlu1 %1560, %v1749_v13  }
  0xa1   : > { %v445_v8 = vadd.f32 %v444_v61, %v423_v52  ;;  %v499_v36 = vadd.f32 %v498_v11, %v432_v0  ;;  %p1583_p13 = pnand %p1582_p12, %p1712_p4  ;;  %p1588_p3 = por %p1587_p2, %p1586_p1 }
  0xa2   : > { %v1827_v42 = vpop.permute.xlu1 %334  ;;  %1563 = vset.pattern.permute.xlu0 %v1825_v41  ;;  %v384_v45 = vpop.permute.xlu2 %383 }
  0xa3   : > { %v446_v29 = vrot.slane %v445_v8, 2  ;;  %v418_v30 = vadd.f32 %v384_v45, %v1832_v43  ;;  %v500_v52 = vrot.slane %v499_v36, 2  ;;  %v411_v60 = vadd.f32 %v1827_v42, %v1832_v43  ;;  %p1584_p0 = pneg %p1583_p13 }
  0xa5   : > { %v434_v45 = vand.u32 2147483647, %v418_v30  ;;  %v501_v4 = vadd.f32 %v500_v52, %v499_v36  ;;  %p1589_p5 = pnand %p1588_p3, %p1584_p0 }
  0xa7   : > { %v510_v63 = vrot.slane %v434_v45, 4 }
  0xa8   : > { %836 = vperm.xlu2 %1561, %v1763_v19   ;;  %830 = vperm.xlu1 %1560, %v1755_v16  }
  0xaa   : > { %v349_v47 = vpop.permute.xlu1 %348  ;;  %1040 = vperm.xlu0 %1563, %v1751_v14   ;;  %v1846_v56 = vpop.permute.xlu2 %397  ;;  %v475_v14 = vadd.f32 %v474_v2, %v428_v58  ;;  %v1873_v58 = vadd.f32 %v454_v40, %v453_v26 }
  0xab   : > { %v413_v46 = vadd.f32 %v349_v47, %v1832_v43 }
  0xac   : > { %v328_v57 = vpop.permute.xlu0 %327  ;;  %v476_v37 = vrot.slane %v475_v14, 2 }
  0xad   : > { %v410_v59 = vadd.f32 %v328_v57, %v1832_v43  ;;  %v429_v61 = vand.u32 2147483647, %v413_v46 }
  0xae   : > { %v477_v55 = vadd.f32 %v476_v37, %v475_v14 }
  0xaf   : > { %v426_v3 = vand.u32 2147483647, %v410_v59  ;;  %v430_v59 = vand.u32 2147483647, %v1864_v44  ;;  %v480_v26 = vrot.slane %v429_v61, 4 }
  0xb0   : > { %854 = vperm.xlu2 %1561, %v1769_v21   ;;  %848 = vperm.xlu1 %1560, %v1771_v22   ;;  %v478_v9 = vrot.slane %v477_v55, 1 }
  0xb1   : > { %v462_v15 = vrot.slane %v426_v3, 4 }
  0xb2   : > { %1088 = vperm.xlu0 %1563, %v1771_v22   ;;  %v363_v1 = vpop.permute.xlu1 %362 }
  0xb3   : > { %v463_v38 = vadd.f32 %v462_v15, %v426_v3  ;;  %v415_v53 = vadd.f32 %v363_v1, %v1832_v43  ;;  %v460_v1 = vrot.slane %v459_v50, 1  ;;  %v441_v3 = vadd.f32 %v440_v51, %v439_v35 }
  0xb4   : > { %v1860_v32 = vpop.permute.xlu0 %404  ;;  %v486_v15 = vrot.slane %v430_v59, 4  ;;  %v502_v35 = vrot.slane %v501_v4, 1 }
  0xb5   : > { %v464_v34 = vrot.slane %v463_v38, 2  ;;  %v442_v33 = vrot.slane %v441_v3, 1  ;;  %v1885_v51 = vadd.f32 %v460_v1, %v459_v50 }
  0xb7   : > { %v465_v10 = vadd.f32 %v464_v34, %v463_v38  ;;  %v1890_v34 = vadd.f32 %v486_v15, %v430_v59 }
  0xb8   : > { %872 = vperm.xlu2 %1561, %v1788_v28   ;;  %866 = vperm.xlu1 %1560, %v1778_v24  }
  0xb9   : > { %v466_v40 = vrot.slane %v465_v10, 1 }
  0xba   : > { %v561_v12 = vpop.permute.xlu2 %560  ;;  %1106 = vperm.xlu0 %1563, %v1778_v24   ;;  %v1867_v48 = vpop.permute.xlu1 %376  ;;  %v447_v24 = vadd.f32 %v446_v29, %v445_v8  ;;  %v431_v8 = vand.u32 2147483647, %v415_v53 }
  0xbb   : > { %v647_v22 = vadd.f32 %v561_v12, %v1855_v7  ;;  %v467_v50 = vadd.f32 %v466_v40, %v465_v10  ;;  %v421_v10 = vadd.f32 %v1860_v32, %v1832_v43 }
  0xbc   : > { %v448_v62 = vrot.slane %v447_v24, 1  ;;  %v492_v36 = vrot.slane %v431_v8, 4 }
  0xbd   : > { %v663_v31 = vand.u32 2147483647, %v647_v22  ;;  %v427_v22 = vand.u32 2147483647, %v411_v60 }
  0xbe   : > { %v449_v29 = vadd.f32 %v448_v62, %v447_v24  ;;  %v1894_v62 = vadd.f32 %v502_v35, %v501_v4 }
  0xbf   : > { %v684_v39 = vrot.slane %v663_v31, 4 }
  0xc0   : > { %1562 = vset.pattern.permute.xlu2 %v1825_v41  ;;  %884 = vperm.xlu1 %1560, %v1776_v23  }
  0xc1   : > { %v685_v49 = vadd.f32 %v684_v39, %v663_v31 }
  0xc2   : > { %v579_v54 = vpop.permute.xlu2 %578  ;;  %1070 = vperm.xlu0 %1563, %v1755_v16   ;;  %v511_v16 = vadd.f32 %v510_v63, %v434_v45  ;;  %v391_v37 = vpop.permute.xlu1 %390  ;;  %v1887_v45 = vadd.f32 %v478_v9, %v477_v55 }
  0xc3   : > { %v686_v57 = vrot.slane %v685_v49, 2  ;;  %v650_v47 = vadd.f32 %v579_v54, %v1855_v7 }
  0xc4   : > { %v567_v14 = vpop.permute.xlu0 %566  ;;  %v512_v52 = vrot.slane %v511_v16, 2 }
  0xc5   : > { %v687_v0 = vadd.f32 %v686_v57, %v685_v49  ;;  %v666_v2 = vand.u32 2147483647, %v650_v47  ;;  %v648_v42 = vadd.f32 %v567_v14, %v1855_v7  ;;  %v1892_v57 = vadd.f32 %v442_v33, %v441_v3 }
  0xc6   : > { %v493_v47 = vadd.f32 %v492_v36, %v431_v8  ;;  %v419_v3 = vadd.f32 %v391_v37, %v1832_v43  ;;  %v437_v37 = vand.u32 2147483647, %v421_v10 }
  0xc7   : > { %v688_v11 = vrot.slane %v687_v0, 1  ;;  %v702_v12 = vrot.slane %v666_v2, 4  ;;  %v664_v38 = vand.u32 2147483647, %v648_v42 }
  0xc8   : > { %1034 = vperm.xlu2 %1562, %v1745_v6   ;;  %1564 = vset.pattern.permute.xlu1 %v1825_v41  ;;  %v468_v6 = vrot.slane %v427_v22, 4  ;;  %v481_v41 = vadd.f32 %v480_v26, %v429_v61  ;;  %v494_v8 = vrot.slane %v493_v47, 2 }
  0xc9   : > { %v689_v30 = vadd.f32 %v688_v11, %v687_v0  ;;  %v703_v31 = vadd.f32 %v702_v12, %v666_v2  ;;  %v690_v24 = vrot.slane %v664_v38, 4 }
  0xca   : > { %v591_v39 = vpop.permute.xlu2 %590  ;;  %1124 = vperm.xlu0 %1563, %v1776_v23   ;;  %v1896_v2 = vadd.f32 %v468_v6, %v427_v22  ;;  %v482_v55 = vrot.slane %v481_v41, 2  ;;  %v1901_v23 = vadd.f32 %v512_v52, %v511_v16  ;;  %v495_v36 = vadd.f32 %v494_v8, %v493_v47 }
  0xcb   : > { %v1882_v44 = vadd.f32 %v689_v30, %v449_v29  ;;  %v704_v46 = vrot.slane %v703_v31, 2  ;;  %v652_v49 = vadd.f32 %v591_v39, %v1855_v7  ;;  %v691_v60 = vadd.f32 %v690_v24, %v664_v38 }
  0xcc   : > { %v597_v61 = vpop.permute.xlu0 %596  ;;  %v470_v42 = vrot.slane %v1896_v2, 2  ;;  %v483_v29 = vadd.f32 %v482_v55, %v481_v41  ;;  %v514_v40 = vrot.slane %v1901_v23, 1 }
  0xcd   : > { %v705_v53 = vadd.f32 %v704_v46, %v703_v31  ;;  %v668_v54 = vand.u32 2147483647, %v652_v49  ;;  %v692_v1 = vrot.slane %v691_v60, 2  ;;  %v653_v9 = vadd.f32 %v597_v61, %v1855_v7 }
  0xce   : > { %v435_v31 = vand.u32 2147483647, %v419_v3  ;;  %v484_v52 = vrot.slane %v483_v29, 1  ;;  %v528_v61 = vrot.slane %v437_v37, 4 }
  0xcf   : > { %v706_v63 = vrot.slane %v705_v53, 1  ;;  %v714_v0 = vrot.slane %v668_v54, 4  ;;  %v693_v11 = vadd.f32 %v692_v1, %v691_v60  ;;  %v669_v12 = vand.u32 2147483647, %v653_v9 }
  0xd0   : > { %1052 = vperm.xlu2 %1562, %v1749_v13   ;;  %1046 = vperm.xlu1 %1564, %v1743_v5   ;;  %v516_v47 = vrot.slane %v435_v31, 4 }
  0xd1   : > { %v707_v59 = vadd.f32 %v706_v63, %v705_v53  ;;  %v715_v4 = vadd.f32 %v714_v0, %v668_v54  ;;  %v694_v16 = vrot.slane %v693_v11, 1  ;;  %v720_v30 = vrot.slane %v669_v12, 4 }
  0xd2   : > { %v609_v14 = vpop.permute.xlu2 %608  ;;  %v555_v15 = vpop.permute.xlu1 %554  ;;  %v496_v0 = vrot.slane %v495_v36, 1 }
  0xd3   : > { %v1906_v22 = vadd.f32 %v707_v59, %v467_v50  ;;  %v716_v26 = vrot.slane %v715_v4, 2  ;;  %v655_v13 = vadd.f32 %v609_v14, %v1855_v7  ;;  %v646_v5 = vadd.f32 %v555_v15, %v1855_v7 }
  0xd4   : > { %v695_v38 = vadd.f32 %v694_v16, %v693_v11  ;;  %v721_v39 = vadd.f32 %v720_v30, %v669_v12  ;;  %v615_v24 = vpop.permute.xlu0 %614  ;;  %v517_v12 = vadd.f32 %v516_v47, %v435_v31 }
  0xd5   : > { %v717_v33 = vadd.f32 %v716_v26, %v715_v4  ;;  %v671_v35 = vand.u32 2147483647, %v655_v13  ;;  %v662_v32 = vand.u32 2147483647, %v646_v5  ;;  %v656_v54 = vadd.f32 %v615_v24, %v1855_v7 }
  0xd6   : > { %v1913_v53 = vadd.f32 %v695_v38, %v1873_v58  ;;  %v722_v41 = vrot.slane %v721_v39, 2  ;;  %v529_v13 = vadd.f32 %v528_v61, %v437_v37  ;;  %v518_v31 = vrot.slane %v517_v12, 2 }
  0xd7   : > { %v718_v46 = vrot.slane %v717_v33, 1  ;;  %v732_v49 = vrot.slane %v671_v35, 4  ;;  %v678_v6 = vrot.slane %v662_v32, 4  ;;  %v672_v1 = vand.u32 2147483647, %v656_v54 }
  0xd8   : > { %1082 = vperm.xlu2 %1562, %v1761_v18   ;;  %1058 = vperm.xlu1 %1564, %v1767_v20   ;;  %v723_v55 = vadd.f32 %v722_v41, %v721_v39  ;;  %v485_v18 = vadd.f32 %v484_v52, %v483_v29 }
  0xd9   : > { %v719_v60 = vadd.f32 %v718_v46, %v717_v33  ;;  %v733_v50 = vadd.f32 %v732_v49, %v671_v35  ;;  %v679_v63 = vadd.f32 %v678_v6, %v662_v32  ;;  %v738_v20 = vrot.slane %v672_v1, 4 }
  0xda   : > { %v627_v9 = vpop.permute.xlu2 %626  ;;  %v573_v59 = vpop.permute.xlu1 %572  ;;  %v724_v10 = vrot.slane %v723_v55, 1  ;;  %v497_v33 = vadd.f32 %v496_v0, %v495_v36  ;;  %v1930_v36 = vadd.f32 %v1867_v48, %v1832_v43  ;;  %v530_v48 = vrot.slane %v529_v13, 2 }
  0xdb   : > { %v1919_v58 = vadd.f32 %v719_v60, %v1887_v45  ;;  %v734_v3 = vrot.slane %v733_v50, 2  ;;  %v680_v4 = vrot.slane %v679_v63, 2  ;;  %v658_v8 = vadd.f32 %v627_v9, %v1855_v7 }
  0xdc   : > { %v649_v11 = vadd.f32 %v573_v59, %v1855_v7  ;;  %v725_v5 = vadd.f32 %v724_v10, %v723_v55  ;;  %v739_v16 = vadd.f32 %v738_v20, %v672_v1  ;;  %v633_v38 = vpop.permute.xlu0 %632  ;;  %v519_v9 = vadd.f32 %v518_v31, %v517_v12 }
  0xdd   : > { %v735_v14 = vadd.f32 %v734_v3, %v733_v50  ;;  %v681_v15 = vadd.f32 %v680_v4, %v679_v63  ;;  %v674_v26 = vand.u32 2147483647, %v658_v8  ;;  %v659_v49 = vadd.f32 %v633_v38, %v1855_v7 }
  0xde   : > { %v665_v30 = vand.u32 2147483647, %v649_v11  ;;  %v1923_v39 = vadd.f32 %v725_v5, %v485_v18  ;;  %v740_v29 = vrot.slane %v739_v16, 2  ;;  %v471_v20 = vadd.f32 %v470_v42, %v1896_v2 }
  0xdf   : > { %v736_v45 = vrot.slane %v735_v14, 1  ;;  %v682_v35 = vrot.slane %v681_v15, 1  ;;  %v750_v32 = vrot.slane %v674_v26, 4  ;;  %v675_v54 = vand.u32 2147483647, %v659_v49 }
  0xe0   : > { %v696_v46 = vrot.slane %v665_v30, 4  ;;  %1100 = vperm.xlu2 %1562, %v1780_v25   ;;  %1094 = vperm.xlu1 %1564, %v1769_v21   ;;  %v741_v52 = vadd.f32 %v740_v29, %v739_v16  ;;  %v433_v16 = vand.u32 2147483647, %v1930_v36 }
  0xe1   : > { %v737_v37 = vadd.f32 %v736_v45, %v735_v14  ;;  %v683_v6 = vadd.f32 %v682_v35, %v681_v15  ;;  %v751_v24 = vadd.f32 %v750_v32, %v674_v26  ;;  %v756_v55 = vrot.slane %v675_v54, 4 }
  0xe2   : > { %v697_v41 = vadd.f32 %v696_v46, %v665_v30  ;;  %v645_v47 = vpop.permute.xlu2 %644  ;;  %v585_v60 = vpop.permute.xlu1 %584  ;;  %v742_v0 = vrot.slane %v741_v52, 1  ;;  %v531_v30 = vadd.f32 %v530_v48, %v529_v13  ;;  %v504_v49 = vrot.slane %v433_v16, 4 }
  0xe3   : > { %v1932_v50 = vadd.f32 %v737_v37, %v497_v33  ;;  %v1935_v63 = vadd.f32 %v683_v6, %v1892_v57  ;;  %v752_v25 = vrot.slane %v751_v24, 2  ;;  %v661_v21 = vadd.f32 %v645_v47, %v1855_v7 }
  0xe4   : > { %v698_v61 = vrot.slane %v697_v41, 2  ;;  %v651_v1 = vadd.f32 %v585_v60, %v1855_v7  ;;  %v743_v4 = vadd.f32 %v742_v0, %v741_v52  ;;  %v757_v18 = vadd.f32 %v756_v55, %v675_v54 }
  0xe5   : > { %v753_v59 = vadd.f32 %v752_v25, %v751_v24  ;;  %v677_v3 = vand.u32 2147483647, %v661_v21  ;;  %v515_v57 = vadd.f32 %v514_v40, %v1901_v23  ;;  %v520_v33 = vrot.slane %v519_v9, 1 }
  0xe6   : > { %v699_v8 = vadd.f32 %v698_v61, %v697_v41  ;;  %v667_v10 = vand.u32 2147483647, %v651_v1  ;;  %v1946_v15 = vadd.f32 %v743_v4, %v1894_v62  ;;  %v758_v26 = vrot.slane %v757_v18, 2 }
  0xe7   : > { %v754_v11 = vrot.slane %v753_v59, 1  ;;  %v768_v14 = vrot.slane %v677_v3, 4  ;;  %v488_v62 = vrot.slane %v1890_v34, 2  ;;  %v532_v31 = vrot.slane %v531_v30, 1 }
  0xe8   : > { %v700_v12 = vrot.slane %v699_v8, 1  ;;  %v708_v5 = vrot.slane %v667_v10, 4  ;;  %1112 = vperm.xlu2 %1562, %v1788_v28   ;;  %1064 = vperm.xlu1 %1564, %v1757_v17   ;;  %v759_v2 = vadd.f32 %v758_v26, %v757_v18  ;;  %v420_v17 = vadd.f32 %v1846_v56, %v1832_v43 }
  0xe9   : > { %v755_v23 = vadd.f32 %v754_v11, %v753_v59  ;;  %v769_v40 = vadd.f32 %v768_v14, %v677_v3  ;;  %v472_v24 = vrot.slane %v471_v20, 1  ;;  %v521_v36 = vadd.f32 %v520_v33, %v519_v9  ;;  %v1970_v9 = vld [vmem:[%s2148_s2 + $0x10] sm:$0xff] }
  0xea   : > { %v701_v45 = vadd.f32 %v700_v12, %v699_v8  ;;  %v709_v42 = vadd.f32 %v708_v5, %v667_v10  ;;  %v603_v35 = vpop.permute.xlu1 %602  ;;  %v760_v13 = vrot.slane %v759_v2, 1  ;;  %v489_v25 = vadd.f32 %v488_v62, %v1890_v34 }
  0xeb   : > { %v1952_v32 = vadd.f32 %v755_v23, %v515_v57  ;;  %v770_v38 = vrot.slane %v769_v40, 2  ;;  %v654_v29 = vadd.f32 %v603_v35, %v1855_v7  ;;  %v533_v21 = vadd.f32 %v532_v31, %v531_v30 }
  0xec   : > { %v1958_v28 = vadd.f32 %v701_v45, %v1885_v51  ;;  %v710_v46 = vrot.slane %v709_v42, 2  ;;  %v761_v52 = vadd.f32 %v760_v13, %v759_v2  ;;  %v1960_v60 = vpop.permute.xlu0 %794  ;;  %v505_v51 = vadd.f32 %v504_v49, %v433_v16 }
  0xed   : > { %v771_v37 = vadd.f32 %v770_v38, %v769_v40  ;;  %v670_v6 = vand.u32 2147483647, %v654_v29  ;;  %v473_v55 = vadd.f32 %v472_v24, %v471_v20  ;;  %v436_v1 = vand.u32 2147483647, %v420_v17 }
  0xee   : > { %v711_v41 = vadd.f32 %v710_v46, %v709_v42  ;;  %v1963_v43 = vadd.f32 %v761_v52, %v521_v36  ;;  %v490_v8 = vrot.slane %v489_v25, 1  ;;  %v506_v10 = vrot.slane %v505_v51, 2 }
  0xef   : > { %v772_v54 = vrot.slane %v771_v37, 1  ;;  %v726_v47 = vrot.slane %v670_v6, 4  ;;  %v522_v14 = vrot.slane %v436_v1, 4 }
  0xf0   : > { %v712_v56 = vrot.slane %v711_v41, 1  ;;  %1076 = vperm.xlu2 %1562, %v1763_v19   ;;  %1118 = vperm.xlu1 %1564, %v1786_v27   ;;  %v491_v16 = vadd.f32 %v490_v8, %v489_v25  ;;  %v507_v30 = vadd.f32 %v506_v10, %v505_v51 }
  0xf1   : > { %v773_v0 = vadd.f32 %v772_v54, %v771_v37  ;;  %v727_v61 = vadd.f32 %v726_v47, %v670_v6  ;;  %v523_v2 = vadd.f32 %v522_v14, %v436_v1 }
  0xf2   : > { %v713_v48 = vadd.f32 %v712_v56, %v711_v41  ;;  %v807_v34 = vpop.permute.xlu2 %806  ;;  %v621_v59 = vpop.permute.xlu1 %620  ;;  %v508_v46 = vrot.slane %v507_v30, 1 }
  0xf3   : > { %v1972_v3 = vadd.f32 %v773_v0, %v533_v21  ;;  %v728_v4 = vrot.slane %v727_v61, 2  ;;  %v888_v19 = vadd.f32 %v807_v34, %v1970_v9  ;;  %v657_v27 = vadd.f32 %v621_v59, %v1855_v7 }
  0xf4   : > { %v1976_v18 = vadd.f32 %v713_v48, %v473_v55  ;;  %v825_v45 = vpop.permute.xlu0 %824  ;;  %v524_v6 = vrot.slane %v523_v2, 2  ;;  %v509_v47 = vadd.f32 %v508_v46, %v507_v30 }
  0xf5   : > { %v729_v57 = vadd.f32 %v728_v4, %v727_v61  ;;  %v904_v20 = vand.u32 2147483647, %v888_v19  ;;  %v673_v11 = vand.u32 2147483647, %v657_v27 }
  0xf6   : > { %v525_v21 = vadd.f32 %v524_v6, %v523_v2 }
  0xf7   : > { %v730_v12 = vrot.slane %v729_v57, 1  ;;  %v930_v26 = vrot.slane %v904_v20, 4  ;;  %v744_v5 = vrot.slane %v673_v11, 4 }
  0xf8   : > { %v526_v59 = vrot.slane %v525_v21, 1 }
  0xf9   : > { %v731_v23 = vadd.f32 %v730_v12, %v729_v57  ;;  %v931_v40 = vadd.f32 %v930_v26, %v904_v20  ;;  %v745_v33 = vadd.f32 %v744_v5, %v673_v11 }
  0xfa   : > { %v819_v42 = vpop.permute.xlu2 %818  ;;  %v639_v35 = vpop.permute.xlu1 %638  ;;  %v527_v57 = vadd.f32 %v526_v59, %v525_v21 }
  0xfb   : > { %v1978_v62 = vadd.f32 %v731_v23, %v491_v16  ;;  %v932_v38 = vrot.slane %v931_v40, 2  ;;  %v746_v29 = vrot.slane %v745_v33, 2  ;;  %v890_v17 = vadd.f32 %v819_v42, %v1970_v9 }
  0xfc   : > { %v660_v13 = vadd.f32 %v639_v35, %v1855_v7  ;;  %v843_v1 = vpop.permute.xlu0 %842  ;;  %v886_v23 = vadd.f32 %v1960_v60, %v1970_v9  ;;  %v2008_v60 = vld [vmem:[%s2148_s2 + $0x18] sm:$0xff] }
  0xfd   : > { %v933_v49 = vadd.f32 %v932_v38, %v931_v40  ;;  %v747_v31 = vadd.f32 %v746_v29, %v745_v33  ;;  %v906_v37 = vand.u32 2147483647, %v890_v17 }
  0xfe   : > { %v676_v24 = vand.u32 2147483647, %v660_v13  ;;  %v902_v42 = vand.u32 2147483647, %v886_v23 }
  0xff   : > { %v934_v36 = vrot.slane %v933_v49, 1  ;;  %v748_v52 = vrot.slane %v747_v31, 1  ;;  %v942_v41 = vrot.slane %v906_v37, 4 }
 0x100   : > { %v762_v54 = vrot.slane %v676_v24, 4  ;;  %v918_v29 = vrot.slane %v902_v42, 4 }
 0x101   : > { %v935_v25 = vadd.f32 %v934_v36, %v933_v49  ;;  %v749_v56 = vadd.f32 %v748_v52, %v747_v31  ;;  %v943_v51 = vadd.f32 %v942_v41, %v906_v37  ;;  %v891_v37 = vadd.f32 %v825_v45, %v1970_v9 }
 0x102   : > { %v763_v0 = vadd.f32 %v762_v54, %v676_v24  ;;  %v837_v19 = vpop.permute.xlu2 %836  ;;  %v919_v31 = vadd.f32 %v918_v29, %v902_v42  ;;  %v894_v24 = vadd.f32 %v843_v1, %v1970_v9 }
 0x103   : > { %v1983_v61 = vadd.f32 %v935_v25, %v1913_v53  ;;  %v1985_v7 = vadd.f32 %v749_v56, %v509_v47  ;;  %v944_v55 = vrot.slane %v943_v51, 2  ;;  %v907_v41 = vand.u32 2147483647, %v891_v37 }
 0x104   : > { %v764_v48 = vrot.slane %v763_v0, 2  ;;  %v861_v26 = vpop.permute.xlu0 %860  ;;  %v920_v52 = vrot.slane %v919_v31, 2  ;;  %v910_v45 = vand.u32 2147483647, %v894_v24 }
 0x105   : > { %v945_v34 = vadd.f32 %v944_v55, %v943_v51 }
 0x106   : > { %v765_v4 = vadd.f32 %v764_v48, %v763_v0  ;;  %v921_v21 = vadd.f32 %v920_v52, %v919_v31  ;;  %v948_v0 = vrot.slane %v907_v41, 4 }
 0x107   : > { %v946_v27 = vrot.slane %v945_v34, 1 }
 0x108   : > { %v766_v8 = vrot.slane %v765_v4, 1 }
 0x109   : > { %v947_v10 = vadd.f32 %v946_v27, %v945_v34  ;;  %v893_v34 = vadd.f32 %v837_v19, %v1970_v9 }
 0x10a   : > { %v767_v20 = vadd.f32 %v766_v8, %v765_v4  ;;  %v801_v11 = vpop.permute.xlu1 %800  ;;  %v1993_v30 = vpop.permute.xlu2 %854  ;;  %v966_v8 = vrot.slane %v910_v45, 4 }
 0x10b   : > { %v1988_v14 = vadd.f32 %v947_v10, %v1906_v22  ;;  %v887_v53 = vadd.f32 %v801_v11, %v1970_v9  ;;  %v949_v11 = vadd.f32 %v948_v0, %v907_v41 }
 0x10c   : > { %v1991_v12 = vadd.f32 %v767_v20, %v527_v57  ;;  %v1997_v22 = vpop.permute.xlu0 %878  ;;  %v922_v20 = vrot.slane %v921_v21, 1  ;;  %v967_v19 = vadd.f32 %v966_v8, %v910_v45 }
 0x10d   : > { %v903_v5 = vand.u32 2147483647, %v887_v53  ;;  %v950_v31 = vrot.slane %v949_v11, 2 }
 0x10f   : > { %v924_v16 = vrot.slane %v903_v5, 4  ;;  %v951_v0 = vadd.f32 %v950_v31, %v949_v11 }
 0x111   : > { %v925_v40 = vadd.f32 %v924_v16, %v903_v5  ;;  %v909_v5 = vand.u32 2147483647, %v893_v34  ;;  %v897_v16 = vadd.f32 %v861_v26, %v1970_v9  ;;  %v896_v26 = vadd.f32 %v1993_v30, %v1970_v9 }
 0x112   : > { %v813_v33 = vpop.permute.xlu1 %812  ;;  %v1999_v13 = vpop.permute.xlu2 %872 }
 0x113   : > { %v926_v2 = vrot.slane %v925_v40, 2  ;;  %v913_v24 = vand.u32 2147483647, %v897_v16  ;;  %v912_v30 = vand.u32 2147483647, %v896_v26  ;;  %v899_v11 = vadd.f32 %v1999_v13, %v1970_v9 }
 0x115   : > { %v927_v35 = vadd.f32 %v926_v2, %v925_v40 }
 0x117   : > { %v928_v38 = vrot.slane %v927_v35, 1 }
 0x119   : > { %v929_v17 = vadd.f32 %v928_v38, %v927_v35 }
 0x11a   : > { %v2001_v46 = vpop.permute.xlu1 %830 }
 0x11b   : > { %v1015_v49 = vadd.f32 %v929_v17, %v1882_v44  ;;  %v923_v17 = vadd.f32 %v922_v20, %v921_v21 }
 0x11c   : > { %v1041_v6 = vpop.permute.xlu0 %1040 }
 0x11d   : > { %v1127_v36 = vadd.f32 %v1041_v6, %v2008_v60  ;;  %v960_v6 = vrot.slane %v909_v5, 4 }
 0x11f   : > { %v1143_v54 = vand.u32 2147483647, %v1127_v36 }
 0x121   : > { %v1164_v51 = vrot.slane %v1143_v54, 4 }
 0x122   : > { %v1035_v47 = vpop.permute.xlu2 %1034  ;;  %v849_v25 = vpop.permute.xlu1 %848 }
 0x123   : > { %v1126_v44 = vadd.f32 %v1035_v47, %v2008_v60  ;;  %v895_v56 = vadd.f32 %v849_v25, %v1970_v9  ;;  %v1165_v1 = vadd.f32 %v1164_v51, %v1143_v54  ;;  %v968_v47 = vrot.slane %v967_v19, 2 }
 0x124   : > { %v1089_v27 = vpop.permute.xlu0 %1088  ;;  %v889_v25 = vadd.f32 %v813_v33, %v1970_v9 }
 0x125   : > { %v1142_v55 = vand.u32 2147483647, %v1126_v44  ;;  %v911_v48 = vand.u32 2147483647, %v895_v56  ;;  %v1166_v10 = vrot.slane %v1165_v1, 2  ;;  %v1135_v57 = vadd.f32 %v1089_v27, %v2008_v60 }
 0x126   : > { %v1014_v56 = vadd.f32 %v923_v17, %v1935_v63  ;;  %v969_v8 = vadd.f32 %v968_v47, %v967_v19 }
 0x127   : > { %v1158_v59 = vrot.slane %v1142_v55, 4  ;;  %v972_v4 = vrot.slane %v911_v48, 4  ;;  %v1167_v23 = vadd.f32 %v1166_v10, %v1165_v1  ;;  %v1151_v40 = vand.u32 2147483647, %v1135_v57 }
 0x128   : > { %v905_v10 = vand.u32 2147483647, %v889_v25  ;;  %v900_v25 = vadd.f32 %v1997_v22, %v1970_v9 }
 0x129   : > { %v1159_v53 = vadd.f32 %v1158_v59, %v1142_v55  ;;  %v973_v35 = vadd.f32 %v972_v4, %v911_v48  ;;  %v1168_v38 = vrot.slane %v1167_v23, 1  ;;  %v1212_v29 = vrot.slane %v1151_v40, 4 }
 0x12a   : > { %v1053_v2 = vpop.permute.xlu2 %1052  ;;  %v867_v44 = vpop.permute.xlu1 %866  ;;  %v961_v55 = vadd.f32 %v960_v6, %v909_v5  ;;  %v984_v48 = vrot.slane %v913_v24, 4  ;;  %v936_v19 = vrot.slane %v905_v10, 4 }
 0x12b   : > { %v1160_v42 = vrot.slane %v1159_v53, 2  ;;  %v1169_v36 = vadd.f32 %v1168_v38, %v1167_v23  ;;  %v1213_v52 = vadd.f32 %v1212_v29, %v1151_v40  ;;  %v974_v54 = vrot.slane %v973_v35, 2 }
 0x12c   : > { %v1129_v4 = vadd.f32 %v1053_v2, %v2008_v60  ;;  %v962_v20 = vrot.slane %v961_v55, 2  ;;  %v952_v2 = vrot.slane %v951_v0, 1 }
 0x12d   : > { %v1161_v37 = vadd.f32 %v1160_v42, %v1159_v53  ;;  %v1255_v45 = vadd.f32 %v1169_v36, %v1015_v49  ;;  %v1214_v21 = vrot.slane %v1213_v52, 2  ;;  %v975_v59 = vadd.f32 %v974_v54, %v973_v35 }
 0x12e   : > { %v985_v53 = vadd.f32 %v984_v48, %v913_v24  ;;  %v1145_v23 = vand.u32 2147483647, %v1129_v4  ;;  %v970_v42 = vrot.slane %v969_v8, 1  ;;  %v978_v35 = vrot.slane %v912_v30, 4 }
 0x12f   : > { %v1162_v41 = vrot.slane %v1161_v37, 1  ;;  %v1271_v33 = vsub.f32 0.0, %v1255_v45  ;;  %v1215_v63 = vadd.f32 %v1214_v21, %v1213_v52  ;;  %v976_v16 = vrot.slane %v975_v59, 1  ;;  %v1107_v52 = vpop.permute.xlu0 %1106 }
 0x130   : > { %v963_v17 = vadd.f32 %v962_v20, %v961_v55  ;;  %v986_v31 = vrot.slane %v985_v53, 2  ;;  %v1176_v13 = vrot.slane %v1145_v23, 4  ;;  %v953_v54 = vadd.f32 %v952_v2, %v951_v0 }
 0x131   : > { %v1163_v51 = vadd.f32 %v1162_v41, %v1161_v37  ;;  %v1216_v38 = vrot.slane %v1215_v63, 1  ;;  %v915_v37 = vand.u32 2147483647, %v899_v11  ;;  %v977_v36 = vadd.f32 %v976_v16, %v975_v59 }
 0x132   : > { %v1083_v34 = vpop.permute.xlu2 %1082  ;;  %v2028_v6 = vpop.permute.xlu1 %884  ;;  %v971_v47 = vadd.f32 %v970_v42, %v969_v8  ;;  %v979_v26 = vadd.f32 %v978_v35, %v912_v30  ;;  %v964_v21 = vrot.slane %v963_v17, 1  ;;  %v987_v55 = vadd.f32 %v986_v31, %v985_v53 }
 0x133   : > { %v1254_v1 = vadd.f32 %v1163_v51, %v1014_v56  ;;  %v1134_v27 = vadd.f32 %v1083_v34, %v2008_v60  ;;  %v937_v56 = vadd.f32 %v936_v19, %v905_v10  ;;  %v1217_v45 = vadd.f32 %v1216_v38, %v1215_v63 }
 0x134   : > { %v996_v48 = vrot.slane %v915_v37, 4  ;;  %v892_v34 = vadd.f32 %v2001_v46, %v1970_v9  ;;  %v1177_v59 = vadd.f32 %v1176_v13, %v1145_v23  ;;  %v898_v4 = vadd.f32 %v867_v44, %v1970_v9 }
 0x135   : > { %v1270_v57 = vsub.f32 0.0, %v1254_v1  ;;  %v1150_v49 = vand.u32 2147483647, %v1134_v27  ;;  %v1023_v1 = vadd.f32 %v977_v36, %v1932_v50  ;;  %v2037_v27 = vadd.f32 %v953_v54, %v1976_v18 }
 0x136   : > { %v1022_v22 = vadd.f32 %v971_v47, %v1978_v62  ;;  %v980_v8 = vrot.slane %v979_v26, 2  ;;  %v916_v30 = vand.u32 2147483647, %v900_v25  ;;  %v938_v10 = vrot.slane %v937_v56, 2 }
 0x137   : > { %v2026_v5 = vsel %vm1302_vm2, %v1271_v33, %v1270_v57  ;;  %v1206_v40 = vrot.slane %v1150_v49, 4  ;;  %v1263_v33 = vadd.f32 %v1217_v45, %v1023_v1  ;;  %v1138_v57 = vadd.f32 %v1107_v52, %v2008_v60 }
 0x138   : > { %v988_v46 = vrot.slane %v987_v55, 1  ;;  %v997_v20 = vadd.f32 %v996_v48, %v915_v37  ;;  %v908_v11 = vand.u32 2147483647, %v892_v34  ;;  %v1178_v16 = vrot.slane %v1177_v59, 2 }
 0x139   : > { %v1207_v29 = vadd.f32 %v1206_v40, %v1150_v49  ;;  %v965_v49 = vadd.f32 %v964_v21, %v963_v17  ;;  %v914_v18 = vand.u32 2147483647, %v898_v4  ;;  %v981_v40 = vadd.f32 %v980_v8, %v979_v26  ;;  %v1071_v17 = vpop.permute.xlu0 %1070 }
 0x13a   : > { %v1101_v24 = vpop.permute.xlu2 %1100  ;;  %v1002_v62 = vrot.slane %v916_v30, 4  ;;  %v939_v35 = vadd.f32 %v938_v10, %v937_v56  ;;  %v1279_v19 = vsub.f32 0.0, %v1263_v33  ;;  %v1154_v38 = vand.u32 2147483647, %v1138_v57 }
 0x13b   : > { %v1208_v41 = vrot.slane %v1207_v29, 2  ;;  %v1137_v50 = vadd.f32 %v1101_v24, %v2008_v60  ;;  %v989_v31 = vadd.f32 %v988_v46, %v987_v55  ;;  %v998_v37 = vrot.slane %v997_v20, 2 }
 0x13c   : > { %v954_v13 = vrot.slane %v908_v11, 4  ;;  %v1179_v52 = vadd.f32 %v1178_v16, %v1177_v59  ;;  %v2048_v47 = vadd.f32 %v965_v49, %v1923_v39  ;;  %v2050_v26 = vadd.f32 %v1002_v62, %v916_v30 }
 0x13d   : > { %v1209_v51 = vadd.f32 %v1208_v41, %v1207_v29  ;;  %v1153_v24 = vand.u32 2147483647, %v1137_v50  ;;  %v990_v41 = vrot.slane %v914_v18, 4  ;;  %v982_v45 = vrot.slane %v981_v40, 1 }
 0x13e   : > { %v1230_v21 = vrot.slane %v1154_v38, 4  ;;  %v1132_v55 = vadd.f32 %v1071_v17, %v2008_v60  ;;  %v2054_v48 = vadd.f32 %v989_v31, %v1985_v7  ;;  %v2056_v34 = vadd.f32 %v998_v37, %v997_v20 }
 0x13f   : > { %v1210_v0 = vrot.slane %v1209_v51, 1  ;;  %v1224_v1 = vrot.slane %v1153_v24, 4  ;;  %v2058_v39 = vadd.f32 %v954_v13, %v908_v11  ;;  %v991_v8 = vadd.f32 %v990_v41, %v914_v18 }
 0x140   : > { %v1004_v10 = vrot.slane %v2050_v26, 2  ;;  %v2063_v7 = vadd.f32 %v982_v45, %v981_v40  ;;  %v1231_v46 = vadd.f32 %v1230_v21, %v1154_v38  ;;  %v1148_v20 = vand.u32 2147483647, %v1132_v55 }
 0x141   : > { %v1211_v63 = vadd.f32 %v1210_v0, %v1209_v51  ;;  %v940_v51 = vrot.slane %v939_v35, 1  ;;  %v1000_v50 = vrot.slane %v2056_v34, 1  ;;  %v956_v16 = vrot.slane %v2058_v39, 2  ;;  %v1125_v62 = vpop.permute.xlu0 %1124 }
 0x142   : > { %v1113_v53 = vpop.permute.xlu2 %1112  ;;  %v1047_v44 = vpop.permute.xlu1 %1046  ;;  %v1232_v38 = vrot.slane %v1231_v46, 2  ;;  %v1194_v17 = vrot.slane %v1148_v20, 4  ;;  %v1141_v37 = vadd.f32 %v1125_v62, %v2008_v60 }
 0x143   : > { %v1262_v23 = vadd.f32 %v1211_v63, %v1022_v22  ;;  %v1139_v2 = vadd.f32 %v1113_v53, %v2008_v60  ;;  %v1128_v42 = vadd.f32 %v1047_v44, %v2008_v60  ;;  %v1180_v22 = vrot.slane %v1179_v52, 1 }
 0x144   : > { %v941_v49 = vadd.f32 %v940_v51, %v939_v35  ;;  %v1225_v53 = vadd.f32 %v1224_v1, %v1153_v24  ;;  %v1195_v21 = vadd.f32 %v1194_v17, %v1148_v20 }
 0x145   : > { %v1278_v29 = vsub.f32 0.0, %v1262_v23  ;;  %v1144_v36 = vand.u32 2147483647, %v1128_v42  ;;  %v1155_v25 = vand.u32 2147483647, %v1139_v2  ;;  %v1181_v18 = vadd.f32 %v1180_v22, %v1179_v52 }
 0x146   : > { %v992_v23 = vrot.slane %v991_v8, 2  ;;  %v901_v42 = vadd.f32 %v2028_v6, %v1970_v9  ;;  %v1017_v35 = vadd.f32 %v941_v49, %v1958_v28  ;;  %v1226_v31 = vrot.slane %v1225_v53, 2 }
 0x147   : > { %v2045_v54 = vsel %vm1302_vm2, %v1279_v19, %v1278_v29  ;;  %v1170_v56 = vrot.slane %v1144_v36, 4  ;;  %v1236_v33 = vrot.slane %v1155_v25, 4  ;;  %v1233_v28 = vadd.f32 %v1232_v38, %v1231_v46 }
 0x148   : > { %v1257_v52 = vadd.f32 %v1181_v18, %v1017_v35  ;;  %v993_v41 = vadd.f32 %v992_v23, %v991_v8  ;;  %v917_v9 = vand.u32 2147483647, %v901_v42  ;;  %v1227_v1 = vadd.f32 %v1226_v31, %v1225_v53 }
 0x149   : > { %v1171_v59 = vadd.f32 %v1170_v56, %v1144_v36  ;;  %v1237_v19 = vadd.f32 %v1236_v33, %v1155_v25  ;;  %v1234_v46 = vrot.slane %v1233_v28, 1  ;;  %v1196_v53 = vrot.slane %v1195_v21, 2 }
 0x14a   : > { %v1077_v4 = vpop.permute.xlu2 %1076  ;;  %v1059_v0 = vpop.permute.xlu1 %1058  ;;  %v1273_v22 = vsub.f32 0.0, %v1257_v52  ;;  %v1228_v18 = vrot.slane %v1227_v1, 1  ;;  %v957_v35 = vadd.f32 %v956_v16, %v2058_v39 }
 0x14b   : > { %v1133_v30 = vadd.f32 %v1077_v4, %v2008_v60  ;;  %v1172_v57 = vrot.slane %v1171_v59, 2  ;;  %v1130_v63 = vadd.f32 %v1059_v0, %v2008_v60  ;;  %v1238_v6 = vrot.slane %v1237_v19, 2 }
 0x14d   : > { %v1173_v44 = vadd.f32 %v1172_v57, %v1171_v59  ;;  %v1146_v11 = vand.u32 2147483647, %v1130_v63  ;;  %v1149_v2 = vand.u32 2147483647, %v1133_v30  ;;  %v1157_v59 = vand.u32 2147483647, %v1141_v37 }
 0x14e   : > { %v994_v30 = vrot.slane %v993_v41, 1  ;;  %v1008_v57 = vrot.slane %v917_v9, 4  ;;  %v1239_v63 = vadd.f32 %v1238_v6, %v1237_v19  ;;  %v1197_v37 = vadd.f32 %v1196_v53, %v1195_v21 }
 0x14f   : > { %v1174_v40 = vrot.slane %v1173_v44, 1  ;;  %v1182_v29 = vrot.slane %v1146_v11, 4  ;;  %v1200_v56 = vrot.slane %v1149_v2, 4  ;;  %v1248_v23 = vrot.slane %v1157_v59, 4 }
 0x150   : > { %v1240_v38 = vrot.slane %v1239_v63, 1  ;;  %v958_v6 = vrot.slane %v957_v35, 1 }
 0x151   : > { %v1175_v24 = vadd.f32 %v1174_v40, %v1173_v44  ;;  %v1183_v36 = vadd.f32 %v1182_v29, %v1146_v11  ;;  %v1201_v33 = vadd.f32 %v1200_v56, %v1149_v2  ;;  %v995_v40 = vadd.f32 %v994_v30, %v993_v41 }
 0x152   : > { %v1095_v13 = vpop.permute.xlu1 %1094  ;;  %v1241_v39 = vadd.f32 %v1240_v38, %v1239_v63 }
 0x153   : > { %v1136_v45 = vadd.f32 %v1095_v13, %v2008_v60  ;;  %v1256_v25 = vadd.f32 %v1175_v24, %v1983_v61  ;;  %v1184_v51 = vrot.slane %v1183_v36, 2  ;;  %v1001_v61 = vadd.f32 %v1000_v50, %v2056_v34 }
 0x154   : > { %v1202_v2 = vrot.slane %v1201_v33, 2  ;;  %v1235_v50 = vadd.f32 %v1234_v46, %v1233_v28  ;;  %v1229_v24 = vadd.f32 %v1228_v18, %v1227_v1  ;;  %v1026_v52 = vadd.f32 %v995_v40, %v1952_v32 }
 0x155   : > { %v1152_v55 = vand.u32 2147483647, %v1136_v45  ;;  %v1272_v4 = vsub.f32 0.0, %v1256_v25  ;;  %v1185_v0 = vadd.f32 %v1184_v51, %v1183_v36  ;;  %v1249_v36 = vadd.f32 %v1248_v23, %v1157_v59 }
 0x156   : > { %v1203_v41 = vadd.f32 %v1202_v2, %v1201_v33  ;;  %v1027_v21 = vadd.f32 %v1001_v61, %v1963_v43  ;;  %v1265_v1 = vadd.f32 %v1229_v24, %v2054_v48  ;;  %v1005_v33 = vadd.f32 %v1004_v10, %v2050_v26 }
 0x157   : > { %v1218_v8 = vrot.slane %v1152_v55, 4  ;;  %v1305_v49 = vsel %vm1304_vm3, %v1272_v4, %v2026_v5  ;;  %v1186_v44 = vrot.slane %v1185_v0, 1  ;;  %v1009_v5 = vadd.f32 %v1008_v57, %v917_v9 }
 0x158   : > { %v1307_v20 = vsel %vm1306_vm4, %v1273_v22, %v1305_v49  ;;  %v1266_v9 = vadd.f32 %v1235_v50, %v1026_v52  ;;  %v1250_v32 = vrot.slane %v1249_v36, 2  ;;  %v1204_v4 = vrot.slane %v1203_v41, 1 }
 0x159   : > { %v1219_v11 = vadd.f32 %v1218_v8, %v1152_v55  ;;  %v1187_v62 = vadd.f32 %v1186_v44, %v1185_v0  ;;  %v1010_v25 = vrot.slane %v1009_v5, 2  ;;  %v1198_v55 = vrot.slane %v1197_v37, 1 }
 0x15a   : > { %v1065_v42 = vpop.permute.xlu1 %1064  ;;  %v1267_v8 = vadd.f32 %v1241_v39, %v1027_v21  ;;  %v1282_v57 = vsub.f32 0.0, %v1266_v9  ;;  %v1281_v48 = vsub.f32 0.0, %v1265_v1  ;;  %v1251_v61 = vadd.f32 %v1250_v32, %v1249_v36 }
 0x15b   : > { %v1220_v29 = vrot.slane %v1219_v11, 2  ;;  %v1131_v19 = vadd.f32 %v1065_v42, %v2008_v60  ;;  %v1258_v34 = vadd.f32 %v1187_v62, %v1988_v14  ;;  %v1024_v14 = vadd.f32 %v2063_v7, %v1946_v15 }
 0x15c   : > { %v959_v15 = vadd.f32 %v958_v6, %v957_v35  ;;  %v1011_v7 = vadd.f32 %v1010_v25, %v1009_v5  ;;  %v1199_v44 = vadd.f32 %v1198_v55, %v1197_v37  ;;  %v1205_v46 = vadd.f32 %v1204_v4, %v1203_v41 }
 0x15d   : > { %v1221_v17 = vadd.f32 %v1220_v29, %v1219_v11  ;;  %v1147_v31 = vand.u32 2147483647, %v1131_v19  ;;  %v1274_v13 = vsub.f32 0.0, %v1258_v34  ;;  %v1283_v53 = vsub.f32 0.0, %v1267_v8 }
 0x15e   : > { %v1020_v26 = vadd.f32 %v959_v15, %v1919_v58  ;;  %v1012_v10 = vrot.slane %v1011_v7, 1  ;;  %v1006_v23 = vrot.slane %v1005_v33, 1  ;;  %v1252_v29 = vrot.slane %v1251_v61, 1 }
 0x15f   : > { %v1222_v56 = vrot.slane %v1221_v17, 1  ;;  %v1188_v45 = vrot.slane %v1147_v31, 4  ;;  %v1309_v16 = vsel %vm1308_vm5, %v1274_v13, %v1307_v20  ;;  %v1261_v19 = vadd.f32 %v1205_v46, %v2048_v47 }
 0x160   : > { %v1260_v2 = vadd.f32 %v1199_v44, %v1020_v26  ;;  %v1013_v5 = vadd.f32 %v1012_v10, %v1011_v7  ;;  %v1007_v38 = vadd.f32 %v1006_v23, %v1005_v33 }
 0x161   : > { %v1223_v51 = vadd.f32 %v1222_v56, %v1221_v17  ;;  %v1189_v28 = vadd.f32 %v1188_v45, %v1147_v31  ;;  %v1253_v31 = vadd.f32 %v1252_v29, %v1251_v61  ;;  %v1277_v37 = vsub.f32 0.0, %v1261_v19 }
 0x162   : > { %v1119_v59 = vpop.permute.xlu1 %1118  ;;  %v1276_v17 = vsub.f32 0.0, %v1260_v2  ;;  %v1029_v47 = vadd.f32 %v1013_v5, %v1972_v3  ;;  %v1028_v13 = vadd.f32 %v1007_v38, %v1991_v12 }
 0x163   : > { %v1264_v0 = vadd.f32 %v1223_v51, %v1024_v14  ;;  %v1190_v22 = vrot.slane %v1189_v28, 2  ;;  %v1140_v30 = vadd.f32 %v1119_v59, %v2008_v60 }
 0x164   : > { %v1269_v56 = vadd.f32 %v1253_v31, %v1029_v47 }
 0x165   : > { %v1280_v63 = vsub.f32 0.0, %v1264_v0  ;;  %v1191_v43 = vadd.f32 %v1190_v22, %v1189_v28  ;;  %v1156_v49 = vand.u32 2147483647, %v1140_v30 }
 0x166   : > { %v1285_v6 = vsub.f32 0.0, %v1269_v56 }
 0x167   : > { %v1317_v60 = vsel %vm1304_vm3, %v1280_v63, %v2045_v54  ;;  %v1192_v20 = vrot.slane %v1191_v43, 1  ;;  %v1242_v11 = vrot.slane %v1156_v49, 4 }
 0x168   : > { %v1318_v18 = vsel %vm1306_vm4, %v1281_v48, %v1317_v60 }
 0x169   : > { %v1193_v62 = vadd.f32 %v1192_v20, %v1191_v43  ;;  %v1243_v42 = vadd.f32 %v1242_v11, %v1156_v49  ;;  %v1319_v40 = vsel %vm1308_vm5, %v1282_v57, %v1318_v18 }
 0x16a   : > { %v1320_v54 = vsel %vm1310_vm6, %v1283_v53, %v1319_v40 }
 0x16b   : > { %v1259_v58 = vadd.f32 %v1193_v62, %v2037_v27  ;;  %v1244_v35 = vrot.slane %v1243_v42, 2 }
 0x16d   : > { %v1275_v34 = vsub.f32 0.0, %v1259_v58  ;;  %v1245_v50 = vadd.f32 %v1244_v35, %v1243_v42 }
 0x16f   : > { %v1311_v24 = vsel %vm1310_vm6, %v1275_v34, %v1309_v16  ;;  %v1246_v36 = vrot.slane %v1245_v50, 1 }
 0x170   : > { %v1313_v27 = vsel %vm1312_vm7, %v1276_v17, %v1311_v24 }
 0x171   : > { %v1247_v52 = vadd.f32 %v1246_v36, %v1245_v50  ;;  %v1315_v41 = vsel %vm1314_vm8, %v1277_v37, %v1313_v27 }
 0x172   : > { %1325 = vst [vmem:[%s242_s18] sm:$0xff] %v1315_v41 }
 0x173   : > { %v1268_v45 = vadd.f32 %v1247_v52, %v1028_v13 }
 0x175   : > { %v1284_v3 = vsub.f32 0.0, %v1268_v45 }
 0x177   : > { %v1321_v25 = vsel %vm1312_vm7, %v1284_v3, %v1320_v54 }
 0x178   : > { %v1322_v39 = vsel %vm1314_vm8, %v1285_v6, %v1321_v25 }
 0x179   : > { %1326 = vst [vmem:[%s242_s18 + $0x8] sm:$0xff] %v1322_v39 }
 0x17a   : > { %1592 = shalt.err (!%p1589_p5)
}
 0x17b   : > { %s1645_s6 = smov 128   ;;  %s1646_s7 = smov 8  }
 0x17c   : > { %1496 = dma.vmem_to_hbm [thread:$0]  (%p1712_p4), %s1351_s12, 256, %s1353_s13, %s1333_s14, %s1645_s6, %s1645_s6, %s1646_s7  }
 0x17d PF: > { %p1502_p6 = scmp.ge.s32.totalorder %s1643_s20, 2  ;;  %s1375_s8 = sand.u32 1, %s1623_s15  }
 0x17e   : > { %s1376_s9 = scalar_lea.sflag [#allocation3], %s1375_s8 }
 0x17f   : > { %p1499_p7 = pnand %p1502_p6, %p1719_p8 }
 0x181   : > { %p1500_p9 = pneg %p1499_p7 }
 0x183   : > { %1618 = dma.done.wait (%p1500_p9), %s1376_s9, 256  }
 0x184   : > { %1620 = vsyncadd (%p1500_p9), %s1376_s9, 4294967040  ;;  %s18_s20 = sadd.s32 1, %s1643_s20   ;;  %s2153_s15 = smov %s1627_s16 }
 0x185   : > { %p15_p10 = scmp.ge.s32.totalorder %s18_s20, 5   ;;  %s2154_s16 = smov %s1631_s17 }
 0x186   : > { %s2155_s17 = smov %s1725_s28  ;;  %s2156_s18 = smov %s1639_s19 }
 0x187   : > { %s2157_s19 = smov %s2159_s23  ;;  %17 = sbr.rel (!%p15_p10) target bundleno = 4 (0x4), region = 89 }
 0x18c   :  { %1382 = vsyncpa [#allocation3], 1 }
 0x18d   :  { %1384 = vsyncpa [#allocation3 + $0x1], 1 }

</bundles_post_ra>
